<compile_context>
chip_gen: v5e
topology: v5e:2x2
jax: 0.10.0
libtpu: 0.0.40
codegen_flags: <defaults>
</compile_context>

<pallas_src>
import functools

import jax
import jax.numpy as jnp
from jax.experimental import pallas as pl
from jax.experimental.pallas import tpu as pltpu


# ----------------------------- tile selection ------------------------------


def _cdiv(a, b):
    return -(-a // b)


def _pick_t_tile(T, B, Cin, Cout, itemsize, *, t_tile_max=2048,
                 vmem_tile_budget=16 << 20, min_steps=4):
    """Pick the lane-axis (T) tile width.

    Preference order: no ragged edge > tile >= 512 lanes > enough total grid
    steps (megacore + pipelining) > larger tile. Double-buffered x/out tiles
    are kept under `vmem_tile_budget` (safe on v7x's 64 MiB VMEM)."""
    if T <= 128:
        return T  # full-dim block is always legal; small-T regime

    def fits(tt):
        return 2 * (Cin + Cout) * tt * itemsize <= vmem_tile_budget

    cands = [tt for tt in range(128, min(T, t_tile_max) + 1, 128) if fits(tt)]
    if T <= t_tile_max and fits(T) and T % 128 != 0:
        cands.append(T)  # full-dim block (legal even if not a multiple of 128)
    if not cands:
        return 128

    def key(tt):
        divides = (T % tt == 0)
        steps = B * _cdiv(T, tt)
        return (divides, tt >= 512, (steps >= min_steps) and tt >= 512, tt)

    return max(cands, key=key)


def _pick_sub_tile(tT, Cout):
    """Lanes per softmax pass: keep the ~3 live (Cout, sub) f32 temporaries
    within about half the 64x4KiB vreg file."""
    if tT % 128 != 0:
        return tT  # odd full-dim tile; single pass
    budget = (128 * 1024) // max(1, 3 * Cout * 4)
    budget = max(128, (budget // 128) * 128)
    if tT <= budget:
        return tT
    best = 128
    for d in range(256, budget + 1, 128):
        if tT % d == 0:
            best = d
    return best


# --------------------------------- kernel ----------------------------------


def _softmax_affine_kernel(w_ref, b_ref, x_ref, o_ref, *, log, inv_t, sub):
    # w_ref : (Cout, Cin) f32     b_ref : (Cout, 1) f32
    # x_ref : (Cin, tT)           o_ref : (Cout, tT)      (batch dim squeezed)
    w = w_ref[...]
    b = b_ref[...]
    tT = x_ref.shape[-1]
    n_sub = tT // sub

    def compute(x):
        logits = jnp.dot(w, x, preferred_element_type=jnp.float32) + b  # MXU
        if inv_t != 1.0:
            logits = logits * inv_t                                     # VPU, free
        # numerically-stable (log-)softmax over the channel axis (axis 0)
        m = jnp.max(logits, axis=0, keepdims=True)
        shifted = logits - m
        ex = jnp.exp(shifted)
        denom = jnp.sum(ex, axis=0, keepdims=True)
        if log:
            return shifted - jnp.log(denom)
        return ex * pl.reciprocal(denom, approx=False)  # exact: columns sum to 1

    if n_sub == 1:
        o_ref[...] = compute(x_ref[...]).astype(o_ref.dtype)
    else:
        @pl.loop(0, n_sub)
        def _(c):
            start = pl.multiple_of(c * sub, 128)
            x = x_ref[:, pl.ds(start, sub)]
            o_ref[:, pl.ds(start, sub)] = compute(x).astype(o_ref.dtype)


# -------------------------------- wrapper ----------------------------------


def softmax_affine_layer(x_nct, weight, bias=None, *, t=1.0, log=True,
                         t_tile_max=2048):
    """x_nct: [B, Cin, T]; weight: [Cout, Cin, 1]; bias: [Cout] -> [B, Cout, T]."""
    B, Cin, T = x_nct.shape
    Cout = weight.shape[0]
    itemsize = jnp.dtype(x_nct.dtype).itemsize

    # Weight/bias stay f32 (tiny, resident across the grid); 1/t applied on
    # the f32 logits inside the kernel (no precision loss for bf16 inputs).
    w2d = weight[:, :, 0].astype(jnp.float32)                    # (Cout, Cin)
    if bias is None:
        bcol = jnp.zeros((Cout, 1), jnp.float32)
    else:
        bcol = bias.astype(jnp.float32).reshape(Cout, 1)         # (Cout, 1)

    tT = _pick_t_tile(T, B, Cin, Cout, itemsize, t_tile_max=t_tile_max)
    sub = _pick_sub_tile(tT, Cout)
    grid = (B, pl.cdiv(T, tT))

    cost = pl.CostEstimate(
        flops=2 * B * T * Cin * Cout,
        transcendentals=B * T * (Cout + 1),
        bytes_accessed=(B * Cin * T + B * Cout * T) * itemsize
        + Cout * Cin * 4 + Cout * 4,
    )

    kernel = functools.partial(_softmax_affine_kernel, log=log,
                               inv_t=1.0 / float(t), sub=sub)

    return pl.pallas_call(
        kernel,
        out_shape=jax.ShapeDtypeStruct((B, Cout, T), x_nct.dtype),
        grid_spec=pltpu.PrefetchScalarGridSpec(
            num_scalar_prefetch=0,
            grid=grid,
            in_specs=[
                pl.BlockSpec((Cout, Cin), lambda b, tt: (0, 0)),
                pl.BlockSpec((Cout, 1), lambda b, tt: (0, 0)),
                pl.BlockSpec((pl.Squeezed(), Cin, tT), lambda b, tt: (b, 0, tt)),
            ],
            out_specs=pl.BlockSpec((pl.Squeezed(), Cout, tT),
                                   lambda b, tt: (b, 0, tt)),
        ),
        compiler_params=pltpu.CompilerParams(
            dimension_semantics=("parallel", "parallel"),
            vmem_limit_bytes=32 * 1024 * 1024,
        ),
        cost_estimate=cost,
    )(w2d, bcol, x_nct)


# ------------------------------- reference ---------------------------------


def _reference(x, weight, bias, *, t, log):
    logits = (jnp.einsum("oi,bit->bot", weight[:, :, 0], x)
              + bias[None, :, None]) / t
    if log:
        return jax.nn.log_softmax(logits, axis=1)
    return jax.nn.softmax(logits, axis=1)


if __name__ == "__main__":
    key = jax.random.PRNGKey(0)
    kx, kw, kb, kx2, kx3 = jax.random.split(key, 5)

    # Small shapes consistent with the module: batch=2, input_dim=32,
    # output_dim=16, frames=8.
    B, Cin, Cout, T = 2, 32, 16, 8
    temperature = 2.0

    x = jax.random.normal(kx, (B, Cin, T), dtype=jnp.float32)
    # TdnnAffine(context=[0]) weight shape: [output_dim, input_dim, 1]
    weight = jax.random.normal(kw, (Cout, Cin, 1), dtype=jnp.float32) * 0.1
    bias = jax.random.normal(kb, (Cout,), dtype=jnp.float32) * 0.1

    # log-softmax path
    out = softmax_affine_layer(x, weight, bias, t=temperature, log=True)
    out = jax.block_until_ready(out)
    ref = _reference(x, weight, bias, t=temperature, log=True)
    assert out.shape == (B, Cout, T)
    assert jnp.allclose(out, ref, atol=1e-5, rtol=1e-5)

    # softmax (non-log) path, exact reciprocal -> tight tolerance
    out_s = softmax_affine_layer(x, weight, bias, t=temperature, log=False)
    out_s = jax.block_until_ready(out_s)
    ref_s = _reference(x, weight, bias, t=temperature, log=False)
    assert jnp.allclose(out_s, ref_s, atol=1e-5, rtol=1e-5)

    # T=640: tile selection picks tT=640 (no ragged edge, single pass).
    T2 = 640
    x2 = jax.random.normal(kx2, (B, Cin, T2), dtype=jnp.float32)
    out2 = softmax_affine_layer(x2, weight, bias, t=temperature, log=True)
    out2 = jax.block_until_ready(out2)
    ref2 = _reference(x2, weight, bias, t=temperature, log=True)
    assert out2.shape == (B, Cout, T2)
    assert jnp.allclose(out2, ref2, atol=1e-5, rtol=1e-5)

    # T=2048: tile selection picks tT=1024 (4 grid steps) and the softmax runs
    # in 512-lane sub-chunks (exercises the pl.loop path).
    T3 = 2048
    x3 = jax.random.normal(kx3, (B, Cin, T3), dtype=jnp.float32)
    out3 = softmax_affine_layer(x3, weight, bias, t=temperature, log=True)
    out3 = jax.block_until_ready(out3)
    ref3 = _reference(x3, weight, bias, t=temperature, log=True)
    assert out3.shape == (B, Cout, T3)
    assert jnp.allclose(out3, ref3, atol=1e-5, rtol=1e-5)

    print("KERNEL_OK")
</pallas_src>

<mosaic_0001>
module attributes {stable_mosaic.version = 11 : i64} {
  func.func @_softmax_affine_kernel(%arg0: i32, %arg1: i32, %arg2: memref<16x32xf32, #tpu.memory_space<vmem>>, %arg3: memref<16x1xf32, #tpu.memory_space<vmem>>, %arg4: memref<1x32x8xf32, #tpu.memory_space<vmem>>, %arg5: memref<1x16x8xf32, #tpu.memory_space<vmem>>) attributes {dimension_semantics = [#tpu.dimension_semantics<parallel>, #tpu.dimension_semantics<parallel>], iteration_bounds = array<i64: 2, 1>, scalar_prefetch = 0 : i64, scratch_operands = 0 : i64, tpu.core_type = #tpu.core_type<tc>, window_params = [{pipeline_mode = #tpu.pipeline_mode<synchronous>, transform_indices = @transform_0, window_bounds = array<i64: 16, 32>}, {pipeline_mode = #tpu.pipeline_mode<synchronous>, transform_indices = @transform_1, window_bounds = array<i64: 16, 1>}, {transform_indices = @transform_2, window_bounds = array<i64: 1, 32, 8>}, {transform_indices = @transform_3, window_bounds = array<i64: 1, 16, 8>}]} {
    %c0 = arith.constant 0 : index
    %c0_0 = arith.constant 0 : index
    %0 = vector.load %arg2[%c0, %c0_0] : memref<16x32xf32, #tpu.memory_space<vmem>>, vector<16x32xf32>
    %c0_1 = arith.constant 0 : index
    %c0_2 = arith.constant 0 : index
    %1 = vector.load %arg3[%c0_1, %c0_2] : memref<16x1xf32, #tpu.memory_space<vmem>>, vector<16x1xf32>
    %c0_3 = arith.constant 0 : index
    %c0_4 = arith.constant 0 : index
    %c0_5 = arith.constant 0 : index
    %2 = vector.load %arg4[%c0_3, %c0_4, %c0_5] : memref<1x32x8xf32, #tpu.memory_space<vmem>>, vector<1x32x8xf32>
    %3 = vector.shape_cast %2 : vector<1x32x8xf32> to vector<32x8xf32>
    %cst = arith.constant dense<0.000000e+00> : vector<16x8xf32>
    %4 = tpu.matmul %0, %3, %cst {dimension_numbers = #tpu.dot_dimension_numbers<[1], [0], [0], [1], [0, 0, 1, 1], [], []>} : vector<16x32xf32>, vector<32x8xf32>, vector<16x8xf32> -> vector<16x8xf32>
    %5 = vector.broadcast %1 : vector<16x1xf32> to vector<16x8xf32>
    %6 = arith.addf %4, %5 : vector<16x8xf32>
    %cst_6 = arith.constant 5.000000e-01 : f32
    %7 = vector.broadcast %cst_6 : f32 to vector<16x8xf32>
    %8 = arith.mulf %6, %7 : vector<16x8xf32>
    %cst_7 = arith.constant dense<0xFF800000> : vector<8xf32>
    %9 = vector.multi_reduction <maximumf>, %8, %cst_7 [0] : vector<16x8xf32> to vector<8xf32>
    %10 = vector.shape_cast %9 : vector<8xf32> to vector<1x8xf32>
    %11 = vector.broadcast %10 : vector<1x8xf32> to vector<16x8xf32>
    %12 = arith.subf %8, %11 : vector<16x8xf32>
    %13 = math.exp %12 : vector<16x8xf32>
    %cst_8 = arith.constant dense<0.000000e+00> : vector<8xf32>
    %14 = vector.multi_reduction <add>, %13, %cst_8 [0] : vector<16x8xf32> to vector<8xf32>
    %15 = vector.shape_cast %14 : vector<8xf32> to vector<1x8xf32>
    %16 = math.log %15 : vector<1x8xf32>
    %17 = vector.broadcast %16 : vector<1x8xf32> to vector<16x8xf32>
    %18 = arith.subf %12, %17 : vector<16x8xf32>
    %c0_9 = arith.constant 0 : index
    %c0_10 = arith.constant 0 : index
    %c0_11 = arith.constant 0 : index
    %19 = vector.load %arg5[%c0_9, %c0_10, %c0_11] : memref<1x16x8xf32, #tpu.memory_space<vmem>>, vector<1x16x8xf32>
    %20 = vector.shape_cast %19 : vector<1x16x8xf32> to vector<16x8xf32>
    %21 = vector.shape_cast %18 : vector<16x8xf32> to vector<1x16x8xf32>
    tpu.vector_store %arg5[%c0_9, %c0_10, %c0_11], %21 {strides = array<i32>} : memref<1x16x8xf32, #tpu.memory_space<vmem>>, vector<1x16x8xf32>,
    return
  }
  func.func @transform_0(%arg0: i32, %arg1: i32) -> (i32, i32) {
    %c0_i32 = arith.constant 0 : i32
    %c0_i32_0 = arith.constant 0 : i32
    %c0_i32_1 = arith.constant 0 : i32
    return %c0_i32, %c0_i32_0 : i32, i32
  }
  func.func @transform_1(%arg0: i32, %arg1: i32) -> (i32, i32) {
    %c0_i32 = arith.constant 0 : i32
    %c0_i32_0 = arith.constant 0 : i32
    %c0_i32_1 = arith.constant 0 : i32
    return %c0_i32, %c0_i32_0 : i32, i32
  }
  func.func @transform_2(%arg0: i32, %arg1: i32) -> (i32, i32, i32) {
    %c0_i32 = arith.constant 0 : i32
    %c0_i32_0 = arith.constant 0 : i32
    return %arg0, %c0_i32, %arg1 : i32, i32, i32
  }
  func.func @transform_3(%arg0: i32, %arg1: i32) -> (i32, i32, i32) {
    %c0_i32 = arith.constant 0 : i32
    %c0_i32_0 = arith.constant 0 : i32
    return %arg0, %c0_i32, %arg1 : i32, i32, i32
  }
}

</mosaic_0001>

<bundles_post_ra>
// kernel: tpu_custom_call.1
= control target key start
LH: loop header
LB: loop body
LE: loop exit
PB: predicated region body
PF: predicated region fallthrough
CT: control target
= control target key end

     0   :  { %s462_s12 = smov 0   ;;  %s464_s13 = smov 0   ;;  %s517_s0 = inlined_call_operand.vmem [shape: f32[16,32], index: 0, kind: input, shape index: {}]   ;;  %s518_s1 = inlined_call_operand.vmem [shape: f32[16,1], index: 1, kind: input, shape index: {}]   ;;  %s519_s2 = inlined_call_operand.vmem [shape: f32[2,32,8], index: 2, kind: input, shape index: {}]   ;;  %s520_s3 = inlined_call_operand.vmem [shape: f32[2,16,8], index: 3, kind: output, shape index: {}]  }
   0x1   :  { %s466_s14 = smov 0  }
   0x2 LB: > { %s25_s15 = sadd.s32 1, %s435_s13  ;;  %p370_p0 = scmp.ge.s32.totalorder %s439_s14, 1  ;;  %s439_s14 = sphi %s466_s14, %s13_s14   ;;  %s435_s13 = sphi %s464_s13, %s522_s13   ;;  %s431_s12 = sphi %s462_s12, %s521_s12  }
   0x3   : > { %p27_p1 = scmp.ge.s32.totalorder %s25_s15, 2  ;;  %p156_p2 = scmp.lt.s32.totalorder %s439_s14, 3 }
   0x5   : > { %s524_s15 = smov (%p27_p1, %s25_s15), 0  ;;  %p157_p3 = pnand %p370_p0, %p156_p2 }
   0x6   : > { %p186_p4 = scmp.lt.s32.totalorder (!%p157_p3), %s431_s12, 1 }
   0x7   : > { %160 = sbr.rel (%p157_p3) target bundleno = 209 (0xd1), region = 32 }
   0xc   : > { %v204_v0 = vld [vmem:[%s518_s1] sm:$0xff]  ;;  %v441_v1 = vmov 0   ;;  %s526_s12 = smov (!%p186_p4, %s431_s12), 1  ;;  %v205_v4 = vld [vmem:[%s518_s1 + $0x8] sm:$0xff]  ;;  %vm220_vm0 = vcmask 261120   ;;  %vm252_vm1 = vcmask 64512  }
   0xd   : > { %410 = vset.pattern.permute.xlu0 %v441_v1  ;;  %s379_s18 = sshll.u32 %s526_s12, 5  ;;  %v202_v7 = vld [vmem:[%s517_s0] sm:$0xff]  ;;  %v203_v8 = vld [vmem:[%s517_s0 + $0x8] sm:$0xff]  ;;  %s380_s28 = sshll.u32 %s526_s12, 4 }
   0xe   : > { %212 = vperm.xlu0 %410, %v204_v0   ;;  %s193_s21 = scalar_lea.vmem %s519_s2, %s379_s18  ;;  %s201_s4 = scalar_lea.vmem %s520_s3, %s380_s28 }
   0xf   : > { %v209_v2 = vld [vmem:[%s193_s21 + $0x18] sm:$0xff]  ;;  %v208_v3 = vld [vmem:[%s193_s21 + $0x10] sm:$0xff]  ;;  %v207_v5 = vld [vmem:[%s193_s21 + $0x8] sm:$0xff] }
  0x10   : > { %239 = vmatpush.msra.mxu0 %v209_v2  ;;  %381 = vmatpush.msra.mxu1 %v209_v2  ;;  %v206_v6 = vld [vmem:[%s193_s21] sm:$0xff] }
  0x12   : > { %240 = vmatpush.msra.mxu0 %v208_v3  ;;  %382 = vmatpush.msra.mxu1 %v208_v3 }
  0x14   : > { %241 = vmatpush.msra.mxu0 %v207_v5  ;;  %383 = vmatpush.msra.mxu1 %v207_v5 }
  0x16   : > { %217 = vperm.xlu0 %410, %v205_v4   ;;  %242 = vmatpush.msra.mxu0 %v206_v6 }
  0x17   : > { %384 = vmatpush.msra.mxu1 %v206_v6  ;;  %375 = vmatmul.msk.f32.vlgmr.msra.gmra.mxu0 %vm220_vm0, %v202_v7 }
  0x18   : > { %376 = vmatmul.msk.f32.vlgmr.msra.gmra.mxu1 %vm220_vm0, %v203_v8 }
  0x80   : > { %v213_v9 = vpop.permute.xlu0 %212 }
  0x88   : > { %v218_v10 = vpop.permute.xlu0 %217 }
  0x94   : > { %v244_v11 = vpop.f32.mrf.mxu0 }
  0x95   : > { %v247_v12 = vpop.f32.mrf.mxu1  ;;  %v245_v13 = vadd.f32 %v244_v11, %v213_v9 }
  0x96   : > { %v248_v14 = vadd.f32 %v247_v12, %v218_v10 }
  0x97   : > { %v250_v15 = vmul.f32 0.5, %v245_v13 }
  0x98   : > { %v251_v16 = vmul.f32 0.5, %v248_v14 }
  0x99   : > { %v253_v17 = vsel %vm252_vm1, %v250_v15, -inf }
  0x9a   : > { %v254_v18 = vsel %vm252_vm1, %v251_v16, -inf }
  0x9b   : > { %v255_v19 = vmax.f32 %v253_v17, %v254_v18 }
  0x9d   : > { %v256_v20 = vrot.slane %v255_v19, 4 }
  0x9f   : > { %v257_v21 = vmax.f32 %v255_v19, %v256_v20 }
  0xa1   : > { %v258_v22 = vrot.slane %v257_v21, 2 }
  0xa3   : > { %v259_v23 = vmax.f32 %v257_v21, %v258_v22 }
  0xa5   : > { %v260_v24 = vrot.slane %v259_v23, 1 }
  0xa7   : > { %v261_v25 = vmax.f32 %v259_v23, %v260_v24 }
  0xa9   : > { %v262_v26 = vsub.f32 %v250_v15, %v261_v25  ;;  %v263_v27 = vsub.f32 %v251_v16, %v261_v25 }
  0xab   : > { %v264_v28 = vmul.f32 1.442695, %v262_v26  ;;  %v266_v29 = vmul.f32 1.442695, %v263_v27 }
  0xad   : > { %411 = vpow2.f32 %v264_v28 }
  0xae   : > { %413 = vpow2.f32 %v266_v29 }
  0xb3   : > { %v412_v30 = vpop.eup %411 }
  0xb4   : > { %v414_v31 = vpop.eup %413  ;;  %v268_v32 = vsel %vm252_vm1, %v412_v30, 0.0 }
  0xb5   : > { %v269_v33 = vsel %vm252_vm1, %v414_v31, 0.0 }
  0xb6   : > { %v270_v34 = vadd.f32 %v269_v33, %v268_v32 }
  0xb8   : > { %v271_v35 = vrot.slane %v270_v34, 4 }
  0xba   : > { %v272_v36 = vadd.f32 %v271_v35, %v270_v34 }
  0xbc   : > { %v273_v37 = vrot.slane %v272_v36, 2 }
  0xbe   : > { %v274_v38 = vadd.f32 %v273_v37, %v272_v36 }
  0xc0   : > { %v275_v39 = vrot.slane %v274_v38, 1 }
  0xc2   : > { %v276_v40 = vadd.f32 %v275_v39, %v274_v38 }
  0xc4   : > { %415 = vlog2.f32 %v276_v40 }
  0xca   : > { %v416_v41 = vpop.eup %415 }
  0xcb   : > { %v278_v42 = vmul.f32 0.6931472, %v416_v41 }
  0xcd   : > { %v279_v43 = vsub.f32 %v262_v26, %v278_v42  ;;  %v280_v44 = vsub.f32 %v263_v27, %v278_v42 }
  0xcf   : > { %281 = vst.msk [vmem:[%s201_s4] sm:$0xff] %vm252_vm1, %v279_v43 }
  0xd0   : > { %282 = vst.msk [vmem:[%s201_s4 + $0x8] sm:$0xff] %vm252_vm1, %v280_v44 }
  0xd1 PF: > { %s13_s14 = sadd.s32 1, %s439_s14   ;;  %s521_s12 = smov %s435_s13 }
  0xd2   : > { %p10_p5 = scmp.ge.s32.totalorder %s13_s14, 4   ;;  %s522_s13 = smov %s524_s15 }
  0xd4   :  { %12 = sbr.rel (!%p10_p5) target bundleno = 2 (0x2), region = 62 }

</bundles_post_ra>
